<compile_context>
chip_gen: v6e
topology: v6e:2x2x1
jax: 0.10.0
libtpu: 0.0.40
codegen_flags: <defaults>
</compile_context>

<pallas_src>
import functools

import jax
import jax.numpy as jnp
from jax import lax
from jax.experimental import pallas as pl
from jax.experimental.pallas import tpu as pltpu

_LANE = 128
# (8, 128K) f32 block = 4 MiB per input per grid step; double-buffered inputs
# (x + y) then use 16 MiB of VMEM -> fits every TPU generation with the scoped
# limit set below, while each step moves >= 8 MiB of HBM data (roofline regime).
_DEFAULT_TK = 128 * 1024


def _round_up(v, m):
    return (v + m - 1) // m * m


def _make_cka_kernel(b, nk_x, nk_y, rem_x, rem_y):
    """Build the fused Gram + CKA kernel (all tile parameters are static)."""
    n_k = max(nk_x, nk_y)

    def _accum(blk, g_ref):
        # X @ X^T via (1,1)-contraction: Mosaic consumes the transposed operand
        # in place, no XLU transpose / relayout copy of the big block.
        g_ref[...] += lax.dot_general(
            blk, blk,
            dimension_numbers=(((1,), (1,)), ((), ())),
            preferred_element_type=jnp.float32,
        )

    def _stream(src_ref, g_ref, nk, rem, k):
        """Accumulate the current feature block of one input into its Gram."""
        if rem == 0:
            if nk == n_k:
                _accum(src_ref[...], g_ref)
            else:
                @pl.when(k < nk)
                def _():
                    _accum(src_ref[...], g_ref)
        else:
            # Full blocks: no masking.
            @pl.when(k < nk - 1)
            def _():
                _accum(src_ref[...], g_ref)

            # Partial last block: zero the out-of-range tail columns before the
            # matmul (Pallas pads partial blocks with undefined data).
            @pl.when(k == nk - 1)
            def _():
                blk = src_ref[...]
                col = lax.broadcasted_iota(jnp.int32, blk.shape, 1)
                _accum(jnp.where(col < rem, blk, 0), g_ref)

    def kernel(x_ref, y_ref, o_ref, gx_ref, gy_ref):
        k = pl.program_id(0)

        @pl.when(k == 0)
        def _():
            gx_ref[...] = jnp.zeros_like(gx_ref)
            gy_ref[...] = jnp.zeros_like(gy_ref)

        _stream(x_ref, gx_ref, nk_x, rem_x, k)
        _stream(y_ref, gy_ref, nk_y, rem_y, k)

        # Finalize: unbiased-HSIC centering + CKA combination, fused into the
        # last grid step (Grams never leave VMEM).
        @pl.when(k == n_k - 1)
        def _():
            n = b
            row = lax.broadcasted_iota(jnp.int32, (n, n), 0)
            col = lax.broadcasted_iota(jnp.int32, (n, n), 1)
            diag = row == col

            def center(g):
                # gram.fill_diagonal_(0)
                g = jnp.where(diag, 0.0, g)
                # means = sum(gram, dim=0) / (n - 2); gram is symmetric so the
                # row-sum and column-sum views hold the same values.
                col_means = jnp.sum(g, axis=0, keepdims=True) / (n - 2)   # (1, n)
                row_means = jnp.sum(g, axis=1, keepdims=True) / (n - 2)   # (n, 1)
                total = jnp.sum(col_means, keepdims=True) / (2 * (n - 1))  # (1, 1)
                g = g - (row_means - total) - (col_means - total)
                # gram.fill_diagonal_(0)
                return jnp.where(diag, 0.0, g)

            gx = center(gx_ref[...])
            gy = center(gy_ref[...])

            scaled_hsic = jnp.sum(gx * gy, keepdims=True)                 # (1, 1)
            norm_x = jnp.sqrt(jnp.sum(gx * gx, keepdims=True)) + 1e-5
            norm_y = jnp.sqrt(jnp.sum(gy * gy, keepdims=True)) + 1e-5
            loss = -scaled_hsic / (norm_x * norm_y) + 1.0                 # (1, 1)
            # Lane-dense output: broadcast the scalar into an (8, 128) slab.
            o_ref[...] = jnp.broadcast_to(loss, o_ref.shape)

    return kernel


@functools.partial(jax.jit, static_argnames=("tk",))
def cka_loss(x: jax.Array, y: jax.Array, *, tk: int = _DEFAULT_TK) -> jax.Array:
    """Linear-kernel CKA loss (rbf_threshold < 0 branch of the torch module)."""
    batch = x.shape[0]
    x2d = x.reshape(batch, -1)
    y2d = y.reshape(batch, -1)
    dx = x2d.shape[1]
    dy = y2d.shape[1]

    # Per-input tile width: as deep as allowed, lane-aligned, never padded in HBM.
    tk_x = min(tk, _round_up(dx, _LANE))
    tk_y = min(tk, _round_up(dy, _LANE))
    nk_x = pl.cdiv(dx, tk_x)
    nk_y = pl.cdiv(dy, tk_y)
    n_k = max(nk_x, nk_y)
    rem_x = dx - (nk_x - 1) * tk_x
    rem_y = dy - (nk_y - 1) * tk_y
    rem_x = 0 if rem_x == tk_x else rem_x   # 0 => last block is full, no mask
    rem_y = 0 if rem_y == tk_y else rem_y

    # Clamp the block index of the shorter stream; Pallas skips the re-fetch
    # when the block index does not change, so no redundant HBM traffic.
    x_map = (lambda k: (0, k)) if nk_x == n_k else (lambda k: (0, jnp.minimum(k, nk_x - 1)))
    y_map = (lambda k: (0, k)) if nk_y == n_k else (lambda k: (0, jnp.minimum(k, nk_y - 1)))

    # Double-buffered input blocks dominate VMEM; raise the scoped limit so the
    # deep tiles keep pipelining on v5e (16 MiB default) while staying well
    # inside v7x's 64 MiB of physical VMEM per core.
    in_buf_bytes = (2 * batch * tk_x * x2d.dtype.itemsize
                    + 2 * batch * tk_y * y2d.dtype.itemsize)
    vmem_limit = int(min(max(in_buf_bytes + (16 << 20), 32 << 20), 56 << 20))

    out = pl.pallas_call(
        _make_cka_kernel(batch, nk_x, nk_y, rem_x, rem_y),
        out_shape=jax.ShapeDtypeStruct((8, _LANE), jnp.float32),
        grid_spec=pltpu.PrefetchScalarGridSpec(
            num_scalar_prefetch=0,
            grid=(n_k,),
            in_specs=[
                pl.BlockSpec((batch, tk_x), x_map),
                pl.BlockSpec((batch, tk_y), y_map),
            ],
            out_specs=pl.BlockSpec((8, _LANE), lambda k: (0, 0)),
            scratch_shapes=[
                pltpu.VMEM((batch, batch), jnp.float32),   # Gram(X) accumulator
                pltpu.VMEM((batch, batch), jnp.float32),   # Gram(Y) accumulator
            ],
        ),
        compiler_params=pltpu.CompilerParams(
            dimension_semantics=("arbitrary",),   # single reduction axis
            vmem_limit_bytes=vmem_limit,
        ),
    )(x2d, y2d)
    return out[0, 0]


def _cka_loss_ref(x, y):
    """Pure-JAX reference mirroring the torch module (linear kernel)."""
    b = x.shape[0]

    def gram(f2d):
        return lax.dot_general(
            f2d, f2d, dimension_numbers=(((1,), (1,)), ((), ())),
            precision=lax.Precision.HIGHEST,
            preferred_element_type=jnp.float32)

    def center(g):
        n = g.shape[0]
        g = g * (1.0 - jnp.eye(n, dtype=g.dtype))
        means = jnp.sum(g, axis=0) / (n - 2)
        means = means - jnp.sum(means) / (2 * (n - 1))
        g = g - means[:, None] - means[None, :]
        return g * (1.0 - jnp.eye(n, dtype=g.dtype))

    gx = center(gram(x.reshape(b, -1).astype(jnp.float32)))
    gy = center(gram(y.reshape(b, -1).astype(jnp.float32)))
    hsic = jnp.sum(gx * gy)
    nx = jnp.sqrt(jnp.sum(gx * gx)) + 1e-5
    ny = jnp.sqrt(jnp.sum(gy * gy)) + 1e-5
    return -hsic / (nx * ny) + 1.0


if __name__ == "__main__":
    key = jax.random.PRNGKey(0)
    kx, ky, kx2, ky2 = jax.random.split(key, 4)

    # Primary test: NCHW feature maps; batch must be > 2 (unbiased centering).
    x = jax.random.normal(kx, (8, 4, 16, 16), dtype=jnp.float32)
    y = jax.random.normal(ky, (8, 4, 16, 16), dtype=jnp.float32)
    loss = cka_loss(x, y)
    jax.block_until_ready(loss)
    ref = _cka_loss_ref(x, y)
    assert bool(jnp.isfinite(loss)), float(loss)
    assert abs(float(loss) - float(ref)) < 1e-2, (float(loss), float(ref))

    # Second test: tiny tile to exercise the multi-block, tail-masked,
    # unequal-feature-dim (clamped stream) path.
    x2 = jax.random.normal(kx2, (8, 3, 10, 10), dtype=jnp.float32)   # D = 300
    y2 = jax.random.normal(ky2, (8, 8, 10, 10), dtype=jnp.float32)   # D = 800
    loss2 = cka_loss(x2, y2, tk=256)
    jax.block_until_ready(loss2)
    ref2 = _cka_loss_ref(x2, y2)
    assert bool(jnp.isfinite(loss2)), float(loss2)
    assert abs(float(loss2) - float(ref2)) < 1e-2, (float(loss2), float(ref2))

    print("KERNEL_OK")
</pallas_src>

<mosaic_0001>
module attributes {stable_mosaic.version = 11 : i64} {
  func.func @kernel(%arg0: i32, %arg1: memref<8x1024xf32, #tpu.memory_space<vmem>>, %arg2: memref<8x1024xf32, #tpu.memory_space<vmem>>, %arg3: memref<8x128xf32, #tpu.memory_space<vmem>>, %arg4: memref<8x8xf32, #tpu.memory_space<vmem>>, %arg5: memref<8x8xf32, #tpu.memory_space<vmem>>) attributes {dimension_semantics = [#tpu.dimension_semantics<arbitrary>], iteration_bounds = array<i64: 1>, scalar_prefetch = 0 : i64, scratch_operands = 2 : i64, tpu.core_type = #tpu.core_type<tc>, window_params = [{transform_indices = @transform_0, window_bounds = array<i64: 8, 1024>}, {transform_indices = @transform_1, window_bounds = array<i64: 8, 1024>}, {pipeline_mode = #tpu.pipeline_mode<synchronous>, transform_indices = @transform_2, window_bounds = array<i64: 8, 128>}]} {
    %c0_i32 = arith.constant 0 : i32
    %0 = arith.cmpi eq, %arg0, %c0_i32 : i32
    %1 = arith.extui %0 : i1 to i32
    %c0_i32_0 = arith.constant 0 : i32
    %2 = arith.cmpi ne, %1, %c0_i32_0 : i32
    scf.if %2 {
      %cst_15 = arith.constant 0.000000e+00 : f32
      %16 = vector.broadcast %cst_15 : f32 to vector<8x8xf32>
      %c0_16 = arith.constant 0 : index
      %c0_17 = arith.constant 0 : index
      %17 = vector.load %arg4[%c0_16, %c0_17] : memref<8x8xf32, #tpu.memory_space<vmem>>, vector<8x8xf32>
      tpu.vector_store %arg4[%c0_16, %c0_17], %16 {strides = array<i32>} : memref<8x8xf32, #tpu.memory_space<vmem>>, vector<8x8xf32>,
      %cst_18 = arith.constant 0.000000e+00 : f32
      %18 = vector.broadcast %cst_18 : f32 to vector<8x8xf32>
      %c0_19 = arith.constant 0 : index
      %c0_20 = arith.constant 0 : index
      %19 = vector.load %arg5[%c0_19, %c0_20] : memref<8x8xf32, #tpu.memory_space<vmem>>, vector<8x8xf32>
      tpu.vector_store %arg5[%c0_19, %c0_20], %18 {strides = array<i32>} : memref<8x8xf32, #tpu.memory_space<vmem>>, vector<8x8xf32>,
    } else {
    }
    %c0 = arith.constant 0 : index
    %c0_1 = arith.constant 0 : index
    %3 = vector.load %arg1[%c0, %c0_1] : memref<8x1024xf32, #tpu.memory_space<vmem>>, vector<8x1024xf32>
    %c0_2 = arith.constant 0 : index
    %c0_3 = arith.constant 0 : index
    %4 = vector.load %arg4[%c0_2, %c0_3] : memref<8x8xf32, #tpu.memory_space<vmem>>, vector<8x8xf32>
    %cst = arith.constant dense<0.000000e+00> : vector<8x8xf32>
    %5 = tpu.matmul %3, %3, %cst {dimension_numbers = #tpu.dot_dimension_numbers<[1], [1], [0], [0], [0, 0, 1, 0], [], []>} : vector<8x1024xf32>, vector<8x1024xf32>, vector<8x8xf32> -> vector<8x8xf32>
    %6 = arith.addf %4, %5 : vector<8x8xf32>
    %c0_4 = arith.constant 0 : index
    %c0_5 = arith.constant 0 : index
    %7 = vector.load %arg4[%c0_4, %c0_5] : memref<8x8xf32, #tpu.memory_space<vmem>>, vector<8x8xf32>
    tpu.vector_store %arg4[%c0_4, %c0_5], %6 {strides = array<i32>} : memref<8x8xf32, #tpu.memory_space<vmem>>, vector<8x8xf32>,
    %c0_6 = arith.constant 0 : index
    %c0_7 = arith.constant 0 : index
    %8 = vector.load %arg2[%c0_6, %c0_7] : memref<8x1024xf32, #tpu.memory_space<vmem>>, vector<8x1024xf32>
    %c0_8 = arith.constant 0 : index
    %c0_9 = arith.constant 0 : index
    %9 = vector.load %arg5[%c0_8, %c0_9] : memref<8x8xf32, #tpu.memory_space<vmem>>, vector<8x8xf32>
    %cst_10 = arith.constant dense<0.000000e+00> : vector<8x8xf32>
    %10 = tpu.matmul %8, %8, %cst_10 {dimension_numbers = #tpu.dot_dimension_numbers<[1], [1], [0], [0], [0, 0, 1, 0], [], []>} : vector<8x1024xf32>, vector<8x1024xf32>, vector<8x8xf32> -> vector<8x8xf32>
    %11 = arith.addf %9, %10 : vector<8x8xf32>
    %c0_11 = arith.constant 0 : index
    %c0_12 = arith.constant 0 : index
    %12 = vector.load %arg5[%c0_11, %c0_12] : memref<8x8xf32, #tpu.memory_space<vmem>>, vector<8x8xf32>
    tpu.vector_store %arg5[%c0_11, %c0_12], %11 {strides = array<i32>} : memref<8x8xf32, #tpu.memory_space<vmem>>, vector<8x8xf32>,
    %c0_i32_13 = arith.constant 0 : i32
    %13 = arith.cmpi eq, %arg0, %c0_i32_13 : i32
    %14 = arith.extui %13 : i1 to i32
    %c0_i32_14 = arith.constant 0 : i32
    %15 = arith.cmpi ne, %14, %c0_i32_14 : i32
    scf.if %15 {
      %16 = tpu.iota {dimensions = array<i32: 0>} : vector<8x8xi32>
      %17 = tpu.iota {dimensions = array<i32: 1>} : vector<8x8xi32>
      %18 = arith.cmpi eq, %16, %17 : vector<8x8xi32>
      %c0_15 = arith.constant 0 : index
      %c0_16 = arith.constant 0 : index
      %19 = vector.load %arg4[%c0_15, %c0_16] : memref<8x8xf32, #tpu.memory_space<vmem>>, vector<8x8xf32>
      %cst_17 = arith.constant 0.000000e+00 : f32
      %20 = vector.broadcast %cst_17 : f32 to vector<8x8xf32>
      %21 = arith.select %18, %20, %19 : vector<8x8xi1>, vector<8x8xf32>
      %cst_18 = arith.constant dense<0.000000e+00> : vector<8xf32>
      %22 = vector.multi_reduction <add>, %21, %cst_18 [0] : vector<8x8xf32> to vector<8xf32>
      %23 = vector.shape_cast %22 : vector<8xf32> to vector<1x8xf32>
      %cst_19 = arith.constant 6.000000e+00 : f32
      %24 = vector.broadcast %cst_19 : f32 to vector<1x8xf32>
      %25 = arith.divf %23, %24 : vector<1x8xf32>
      %cst_20 = arith.constant dense<0.000000e+00> : vector<8xf32>
      %26 = vector.multi_reduction <add>, %21, %cst_20 [1] : vector<8x8xf32> to vector<8xf32>
      %27 = vector.shape_cast %26 : vector<8xf32> to vector<8x1xf32>
      %cst_21 = arith.constant 6.000000e+00 : f32
      %28 = vector.broadcast %cst_21 : f32 to vector<8x1xf32>
      %29 = arith.divf %27, %28 : vector<8x1xf32>
      %30 = vector.shape_cast %25 : vector<1x8xf32> to vector<1x1x8xf32>
      %cst_22 = arith.constant dense<0.000000e+00> : vector<1xf32>
      %31 = vector.multi_reduction <add>, %30, %cst_22 [1, 2] : vector<1x1x8xf32> to vector<1xf32>
      %32 = vector.shape_cast %31 : vector<1xf32> to vector<1x1x1xf32>
      %33 = vector.extract %32[0, 0, 0] : f32 from vector<1x1x1xf32>
      %34 = vector.broadcast %33 : f32 to vector<1x1xf32>
      %cst_23 = arith.constant 1.400000e+01 : f32
      %35 = vector.broadcast %cst_23 : f32 to vector<1x1xf32>
      %36 = arith.divf %34, %35 : vector<1x1xf32>
      %37 = vector.broadcast %36 : vector<1x1xf32> to vector<8x1xf32>
      %38 = arith.subf %29, %37 : vector<8x1xf32>
      %39 = vector.broadcast %38 : vector<8x1xf32> to vector<8x8xf32>
      %40 = arith.subf %21, %39 : vector<8x8xf32>
      %41 = vector.broadcast %36 : vector<1x1xf32> to vector<1x8xf32>
      %42 = arith.subf %25, %41 : vector<1x8xf32>
      %43 = vector.broadcast %42 : vector<1x8xf32> to vector<8x8xf32>
      %44 = arith.subf %40, %43 : vector<8x8xf32>
      %cst_24 = arith.constant 0.000000e+00 : f32
      %45 = vector.broadcast %cst_24 : f32 to vector<8x8xf32>
      %46 = arith.select %18, %45, %44 : vector<8x8xi1>, vector<8x8xf32>
      %c0_25 = arith.constant 0 : index
      %c0_26 = arith.constant 0 : index
      %47 = vector.load %arg5[%c0_25, %c0_26] : memref<8x8xf32, #tpu.memory_space<vmem>>, vector<8x8xf32>
      %cst_27 = arith.constant 0.000000e+00 : f32
      %48 = vector.broadcast %cst_27 : f32 to vector<8x8xf32>
      %49 = arith.select %18, %48, %47 : vector<8x8xi1>, vector<8x8xf32>
      %cst_28 = arith.constant dense<0.000000e+00> : vector<8xf32>
      %50 = vector.multi_reduction <add>, %49, %cst_28 [0] : vector<8x8xf32> to vector<8xf32>
      %51 = vector.shape_cast %50 : vector<8xf32> to vector<1x8xf32>
      %cst_29 = arith.constant 6.000000e+00 : f32
      %52 = vector.broadcast %cst_29 : f32 to vector<1x8xf32>
      %53 = arith.divf %51, %52 : vector<1x8xf32>
      %cst_30 = arith.constant dense<0.000000e+00> : vector<8xf32>
      %54 = vector.multi_reduction <add>, %49, %cst_30 [1] : vector<8x8xf32> to vector<8xf32>
      %55 = vector.shape_cast %54 : vector<8xf32> to vector<8x1xf32>
      %cst_31 = arith.constant 6.000000e+00 : f32
      %56 = vector.broadcast %cst_31 : f32 to vector<8x1xf32>
      %57 = arith.divf %55, %56 : vector<8x1xf32>
      %58 = vector.shape_cast %53 : vector<1x8xf32> to vector<1x1x8xf32>
      %cst_32 = arith.constant dense<0.000000e+00> : vector<1xf32>
      %59 = vector.multi_reduction <add>, %58, %cst_32 [1, 2] : vector<1x1x8xf32> to vector<1xf32>
      %60 = vector.shape_cast %59 : vector<1xf32> to vector<1x1x1xf32>
      %61 = vector.extract %60[0, 0, 0] : f32 from vector<1x1x1xf32>
      %62 = vector.broadcast %61 : f32 to vector<1x1xf32>
      %cst_33 = arith.constant 1.400000e+01 : f32
      %63 = vector.broadcast %cst_33 : f32 to vector<1x1xf32>
      %64 = arith.divf %62, %63 : vector<1x1xf32>
      %65 = vector.broadcast %64 : vector<1x1xf32> to vector<8x1xf32>
      %66 = arith.subf %57, %65 : vector<8x1xf32>
      %67 = vector.broadcast %66 : vector<8x1xf32> to vector<8x8xf32>
      %68 = arith.subf %49, %67 : vector<8x8xf32>
      %69 = vector.broadcast %64 : vector<1x1xf32> to vector<1x8xf32>
      %70 = arith.subf %53, %69 : vector<1x8xf32>
      %71 = vector.broadcast %70 : vector<1x8xf32> to vector<8x8xf32>
      %72 = arith.subf %68, %71 : vector<8x8xf32>
      %cst_34 = arith.constant 0.000000e+00 : f32
      %73 = vector.broadcast %cst_34 : f32 to vector<8x8xf32>
      %74 = arith.select %18, %73, %72 : vector<8x8xi1>, vector<8x8xf32>
      %75 = arith.mulf %46, %74 : vector<8x8xf32>
      %76 = vector.shape_cast %75 : vector<8x8xf32> to vector<1x8x8xf32>
      %cst_35 = arith.constant dense<0.000000e+00> : vector<1xf32>
      %77 = vector.multi_reduction <add>, %76, %cst_35 [1, 2] : vector<1x8x8xf32> to vector<1xf32>
      %78 = vector.shape_cast %77 : vector<1xf32> to vector<1x1x1xf32>
      %79 = vector.extract %78[0, 0, 0] : f32 from vector<1x1x1xf32>
      %80 = vector.broadcast %79 : f32 to vector<1x1xf32>
      %81 = arith.mulf %46, %46 : vector<8x8xf32>
      %82 = vector.shape_cast %81 : vector<8x8xf32> to vector<1x8x8xf32>
      %cst_36 = arith.constant dense<0.000000e+00> : vector<1xf32>
      %83 = vector.multi_reduction <add>, %82, %cst_36 [1, 2] : vector<1x8x8xf32> to vector<1xf32>
      %84 = vector.shape_cast %83 : vector<1xf32> to vector<1x1x1xf32>
      %85 = vector.extract %84[0, 0, 0] : f32 from vector<1x1x1xf32>
      %86 = vector.broadcast %85 : f32 to vector<1x1xf32>
      %87 = math.sqrt %86 : vector<1x1xf32>
      %cst_37 = arith.constant 9.99999974E-6 : f32
      %88 = vector.broadcast %cst_37 : f32 to vector<1x1xf32>
      %89 = arith.addf %87, %88 : vector<1x1xf32>
      %90 = arith.mulf %74, %74 : vector<8x8xf32>
      %91 = vector.shape_cast %90 : vector<8x8xf32> to vector<1x8x8xf32>
      %cst_38 = arith.constant dense<0.000000e+00> : vector<1xf32>
      %92 = vector.multi_reduction <add>, %91, %cst_38 [1, 2] : vector<1x8x8xf32> to vector<1xf32>
      %93 = vector.shape_cast %92 : vector<1xf32> to vector<1x1x1xf32>
      %94 = vector.extract %93[0, 0, 0] : f32 from vector<1x1x1xf32>
      %95 = vector.broadcast %94 : f32 to vector<1x1xf32>
      %96 = math.sqrt %95 : vector<1x1xf32>
      %cst_39 = arith.constant 9.99999974E-6 : f32
      %97 = vector.broadcast %cst_39 : f32 to vector<1x1xf32>
      %98 = arith.addf %96, %97 : vector<1x1xf32>
      %cst_40 = arith.constant 0.000000e+00 : f32
      %99 = vector.broadcast %cst_40 : f32 to vector<1x1xf32>
      %100 = arith.subf %99, %80 : vector<1x1xf32>
      %101 = arith.mulf %89, %98 : vector<1x1xf32>
      %102 = arith.divf %100, %101 : vector<1x1xf32>
      %cst_41 = arith.constant 1.000000e+00 : f32
      %103 = vector.broadcast %cst_41 : f32 to vector<1x1xf32>
      %104 = arith.addf %102, %103 : vector<1x1xf32>
      %105 = vector.shape_cast %104 : vector<1x1xf32> to vector<1x1xf32>
      %106 = vector.broadcast %105 : vector<1x1xf32> to vector<8x128xf32>
      %c0_42 = arith.constant 0 : index
      %c0_43 = arith.constant 0 : index
      %107 = vector.load %arg3[%c0_42, %c0_43] : memref<8x128xf32, #tpu.memory_space<vmem>>, vector<8x128xf32>
      tpu.vector_store %arg3[%c0_42, %c0_43], %106 {strides = array<i32>} : memref<8x128xf32, #tpu.memory_space<vmem>>, vector<8x128xf32>,
    } else {
    }
    return
  }
  func.func @transform_0(%arg0: i32) -> (i32, i32) {
    %c0_i32 = arith.constant 0 : i32
    %c0_i32_0 = arith.constant 0 : i32
    return %c0_i32, %arg0 : i32, i32
  }
  func.func @transform_1(%arg0: i32) -> (i32, i32) {
    %c0_i32 = arith.constant 0 : i32
    %c0_i32_0 = arith.constant 0 : i32
    return %c0_i32, %arg0 : i32, i32
  }
  func.func @transform_2(%arg0: i32) -> (i32, i32) {
    %c0_i32 = arith.constant 0 : i32
    %c0_i32_0 = arith.constant 0 : i32
    %c0_i32_1 = arith.constant 0 : i32
    return %c0_i32, %c0_i32_0 : i32, i32
  }
}

</mosaic_0001>

<bundles_post_ra>
// kernel: cka_loss.1
= control target key start
LH: loop header
LB: loop body
LE: loop exit
PB: predicated region body
PF: predicated region fallthrough
CT: control target
= control target key end

     0   :  { %vm15_vm0 = vcmask 64512   ;;  %v751_v16 = vmov 0.0   ;;  %v604_v31 = vlaneseq  ;;  %vm623_vm2 = vcmask 57344   ;;  %s845_s0 = inlined_call_operand.vmem [shape: f32[8,1024], index: 0, kind: input, shape index: {}]   ;;  %s846_s1 = inlined_call_operand.vmem [shape: f32[8,1024], index: 1, kind: input, shape index: {}]   ;;  %s847_s2 = inlined_call_operand.vmem [shape: f32[8,128], index: 2, kind: output, shape index: {}]  }
   0x1   :  { %v19_v0 = vld [vmem:[%s845_s0 + $0x8] sm:$0xff]  ;;  %v18_v1 = vld [vmem:[%s845_s0] sm:$0xff]  ;;  %v21_v2 = vld [vmem:[%s845_s0 + $0x18] sm:$0xff]  ;;  %16 = vst.msk [vmem:[#allocation2] sm:$0xff] %vm15_vm0, %v751_v16 }
   0x2   :  { %57 = vmatprep.subr.mxu0 %v19_v0  ;;  %127 = vmatprep.subr.mxu1 %v21_v2  ;;  %v20_v3 = vld [vmem:[%s845_s0 + $0x10] sm:$0xff]  ;;  %v23_v4 = vld [vmem:[%s845_s0 + $0x28] sm:$0xff]  ;;  %v25_v5 = vld [vmem:[%s845_s0 + $0x38] sm:$0xff]  ;;  %17 = vst.msk [vmem:[#allocation3] sm:$0xff] %vm15_vm0, %v751_v16  ;;  %v818_v38 = vshrl.u32 %v604_v31, 7  ;;  %v820_v39 = vand.u32 127, %v604_v31 }
   0x3   :  { %58 = vmatpush1.xpose.msra.mxu0 %v18_v1  ;;  %128 = vmatpush1.xpose.msra.mxu1 %v20_v3  ;;  %v22_v6 = vld [vmem:[%s845_s0 + $0x20] sm:$0xff]  ;;  %v24_v7 = vld [vmem:[%s845_s0 + $0x30] sm:$0xff]  ;;  %v311_v8 = vld [vmem:[%s846_s1 + $0x8] sm:$0xff] }
   0x4   :  { %91 = vmatprep.mubr.f32.mxu0 %v19_v0  ;;  %161 = vmatprep.mubr.f32.mxu1 %v21_v2  ;;  %v313_v9 = vld [vmem:[%s846_s1 + $0x18] sm:$0xff]  ;;  %v310_v10 = vld [vmem:[%s846_s1] sm:$0xff]  ;;  %v312_v11 = vld [vmem:[%s846_s1 + $0x10] sm:$0xff]  ;;  %vm608_vm1 = vcmp.eq.s32.totalorder %v818_v38, %v820_v39 }
   0x5   :  { %197 = vmatprep.subr.mxu0 %v23_v4  ;;  %267 = vmatprep.subr.mxu1 %v25_v5  ;;  %v315_v12 = vld [vmem:[%s846_s1 + $0x28] sm:$0xff]  ;;  %v317_v13 = vld [vmem:[%s846_s1 + $0x38] sm:$0xff]  ;;  %v314_v14 = vld [vmem:[%s846_s1 + $0x20] sm:$0xff] }
   0x6   :  { %92 = vmatmul.mubr.f32.vlgmr.msra.gmra.mxu0 %v18_v1  ;;  %162 = vmatmul.mubr.f32.vlgmr.msra.gmra.mxu1 %v20_v3  ;;  %v316_v15 = vld [vmem:[%s846_s1 + $0x30] sm:$0xff] }
   0x7   :  { %198 = vmatpush1.xpose.msra.mxu0 %v22_v6  ;;  %268 = vmatpush1.xpose.msra.mxu1 %v24_v7 }
   0x8   :  { %231 = vmatprep.mubr.f32.mxu0 %v23_v4  ;;  %301 = vmatprep.mubr.f32.mxu1 %v25_v5  ;;  %v26_v25 = vld [vmem:[#allocation2] sm:$0xff] }
   0x9   :  { %349 = vmatprep.subr.mxu0 %v311_v8  ;;  %419 = vmatprep.subr.mxu1 %v313_v9  ;;  %v318_v41 = vld [vmem:[#allocation3] sm:$0xff] }
   0xa   :  { %232 = vmatmul.mubr.f32.vlgmr.msra.gmra.mxu0 %v22_v6  ;;  %302 = vmatmul.mubr.f32.vlgmr.msra.gmra.mxu1 %v24_v7 }
   0xb   :  { %350 = vmatpush1.xpose.msra.mxu0 %v310_v10  ;;  %420 = vmatpush1.xpose.msra.mxu1 %v312_v11 }
   0xc   :  { %383 = vmatprep.mubr.f32.mxu0 %v311_v8  ;;  %453 = vmatprep.mubr.f32.mxu1 %v313_v9 }
   0xd   :  { %489 = vmatprep.subr.mxu0 %v315_v12  ;;  %559 = vmatprep.subr.mxu1 %v317_v13 }
   0xe   :  { %384 = vmatmul.mubr.f32.vlgmr.msra.gmra.mxu0 %v310_v10  ;;  %454 = vmatmul.mubr.f32.vlgmr.msra.gmra.mxu1 %v312_v11 }
   0xf   :  { %490 = vmatpush1.xpose.msra.mxu0 %v314_v14  ;;  %560 = vmatpush1.xpose.msra.mxu1 %v316_v15 }
  0x10   :  { %523 = vmatprep.mubr.f32.mxu0 %v315_v12  ;;  %593 = vmatprep.mubr.f32.mxu1 %v317_v13 }
  0x12   :  { %524 = vmatmul.mubr.f32.vlgmr.msra.gmra.mxu0 %v314_v14  ;;  %594 = vmatmul.mubr.f32.vlgmr.msra.gmra.mxu1 %v316_v15 }
  0xc6   :  { %v93_v17 = vpop.f32.mrf.mxu0  ;;  %v163_v18 = vpop.f32.mrf.mxu1 }
  0xc7   :  { %v164_v21 = vadd.f32 %v163_v18, %v93_v17 }
  0xc8   :  { %v95_v19 = vpop.f32.mrf.mxu0  ;;  %v165_v20 = vpop.f32.mrf.mxu1 }
  0xca   :  { %v233_v22 = vpop.f32.mrf.mxu0  ;;  %v303_v23 = vpop.f32.mrf.mxu1 }
  0xcb   :  { %v234_v24 = vadd.f32 %v233_v22, %v164_v21 }
  0xcc   :  { %v235_v26 = vpop.f32.mrf.mxu0  ;;  %v305_v27 = vpop.f32.mrf.mxu1 }
  0xcd   :  { %v304_v28 = vadd.f32 %v303_v23, %v234_v24 }
  0xce   :  { %v385_v29 = vpop.f32.mrf.mxu0  ;;  %v455_v30 = vpop.f32.mrf.mxu1 }
  0xcf   :  { %v307_v32 = vadd.f32 %v304_v28, %v26_v25  ;;  %v456_v35 = vadd.f32 %v455_v30, %v385_v29 }
  0xd0   :  { %v387_v33 = vpop.f32.mrf.mxu0  ;;  %v457_v34 = vpop.f32.mrf.mxu1 }
  0xd1   :  { %309 = vst.msk [vmem:[#allocation2] sm:$0xff] %vm15_vm0, %v307_v32 }
  0xd2   :  { %v525_v36 = vpop.f32.mrf.mxu0  ;;  %v595_v37 = vpop.f32.mrf.mxu1 }
  0xd3   :  { %v526_v40 = vadd.f32 %v525_v36, %v456_v35 }
  0xd4   :  { %v527_v42 = vpop.f32.mrf.mxu0  ;;  %v597_v43 = vpop.f32.mrf.mxu1 }
  0xd5   :  { %v596_v44 = vadd.f32 %v595_v37, %v526_v40 }
  0xd7   :  { %v599_v45 = vadd.f32 %v596_v44, %v318_v41 }
  0xd8   :  { %v609_v46 = vld [vmem:[#allocation2] sm:$0xff] }
  0xd9   :  { %600 = vst.msk [vmem:[#allocation3] sm:$0xff] %vm15_vm0, %v599_v45  ;;  %v610_v47 = vsel %vm608_vm1, 0.0, %v609_v46 }
  0xda   :  { %v611_v48 = vsel %vm15_vm0, %v610_v47, 0.0 }
  0xdb   :  { %620 = vadd.xlane.f32.xlu1 %v611_v48  ;;  %v612_v49 = vrot.slane %v611_v48, 4 }
  0xdd   :  { %v613_v50 = vadd.f32 %v612_v49, %v611_v48 }
  0xdf   :  { %v614_v51 = vrot.slane %v613_v50, 2 }
  0xe0   :  { %v642_v52 = vld [vmem:[#allocation3] sm:$0xff] }
  0xe1   :  { %v643_v53 = vsel %vm608_vm1, 0.0, %v642_v52  ;;  %v615_v54 = vadd.f32 %v614_v51, %v613_v50 }
  0xe2   :  { %v644_v55 = vsel %vm15_vm0, %v643_v53, 0.0 }
  0xe3   :  { %v645_v56 = vrot.slane %v644_v55, 4  ;;  %652 = vadd.xlane.f32.xlu1 %v644_v55  ;;  %v616_v57 = vrot.slane %v615_v54, 1 }
  0xe5   :  { %v646_v58 = vadd.f32 %v645_v56, %v644_v55  ;;  %v617_v59 = vadd.f32 %v616_v57, %v615_v54 }
  0xe7   :  { %v647_v60 = vrot.slane %v646_v58, 2  ;;  %v619_v61 = vmul.f32 0.16666667, %v617_v59 }
  0xe9   :  { %v624_v62 = vsel %vm623_vm2, %v619_v61, 0.0  ;;  %v648_v63 = vadd.f32 %v647_v60, %v646_v58 }
  0xea   :  { %625 = vadd.xlane.f32.xlu0 %v624_v62 }
  0xeb   :  { %v649_v0 = vrot.slane %v648_v63, 1 }
  0xed   :  { %v650_v1 = vadd.f32 %v649_v0, %v648_v63 }
  0xef   :  { %v651_v2 = vmul.f32 0.16666667, %v650_v1 }
  0xf1   :  { %v655_v3 = vsel %vm623_vm2, %v651_v2, 0.0 }
  0xf2   :  { %656 = vadd.xlane.f32.xlu0 %v655_v3 }
 0x164   :  { %v621_v18 = vpop.xlane.xlu1 %620 }
 0x165   :  { %v622_v20 = vmul.f32 0.16666667, %v621_v18 }
 0x16c   :  { %v653_v25 = vpop.xlane.xlu1 %652 }
 0x16d   :  { %v654_v28 = vmul.f32 0.16666667, %v653_v25 }
 0x173   :  { %v626_v4 = vpop.xlane.xlu0 %625 }
 0x174   :  { %v627_v5 = vrot.slane %v626_v4, 4 }
 0x176   :  { %v628_v6 = vadd.f32 %v627_v5, %v626_v4 }
 0x178   :  { %v629_v7 = vrot.slane %v628_v6, 2 }
 0x17a   :  { %v630_v8 = vadd.f32 %v629_v7, %v628_v6 }
 0x17b   :  { %v657_v9 = vpop.xlane.xlu0 %656 }
 0x17c   :  { %v658_v10 = vrot.slane %v657_v9, 4  ;;  %v631_v11 = vrot.slane %v630_v8, 1 }
 0x17e   :  { %v659_v12 = vadd.f32 %v658_v10, %v657_v9  ;;  %v632_v13 = vadd.f32 %v631_v11, %v630_v8 }
 0x180   :  { %v660_v14 = vrot.slane %v659_v12, 2  ;;  %734 = vpush %v632_v13 }
 0x182   :  { %v661_v15 = vadd.f32 %v660_v14, %v659_v12 }
 0x184   :  { %v662_v16 = vrot.slane %v661_v15, 1 }
 0x186   :  { %v663_v17 = vadd.f32 %v662_v16, %v661_v15 }
 0x188   :  { %736 = vpush %v663_v17 }
 0x1b1   :  { %s735_s1 = spop %734 }
 0x1b2   :  { %v634_v19 = vstv %s735_s1 }
 0x1b3   :  { %v636_v21 = vmul.f32 0.071428575, %v634_v19 }
 0x1b5   :  { %v637_v22 = vsub.f32 %v622_v20, %v636_v21  ;;  %v639_v24 = vsub.f32 %v619_v61, %v636_v21 }
 0x1b7   :  { %v638_v23 = vsub.f32 %v610_v47, %v637_v22 }
 0x1b9   :  { %v640_v26 = vsub.f32 %v638_v23, %v639_v24  ;;  %s737_s12 = spop %736 }
 0x1ba   :  { %v665_v27 = vstv %s737_s12 }
 0x1bb   :  { %v666_v29 = vmul.f32 0.071428575, %v665_v27  ;;  %v641_v30 = vsel %vm608_vm1, 0.0, %v640_v26 }
 0x1bc   :  { %v684_v31 = vmul.f32 %v641_v30, %v641_v30 }
 0x1bd   :  { %v667_v32 = vsub.f32 %v654_v28, %v666_v29  ;;  %v669_v35 = vsub.f32 %v651_v2, %v666_v29 }
 0x1be   :  { %v685_v33 = vsel %vm15_vm0, %v684_v31, 0.0 }
 0x1bf   :  { %v668_v34 = vsub.f32 %v643_v53, %v667_v32  ;;  %686 = vadd.xlane.f32.xlu1 %v685_v33 }
 0x1c1   :  { %v670_v36 = vsub.f32 %v668_v34, %v669_v35 }
 0x1c3   :  { %v671_v37 = vsel %vm608_vm1, 0.0, %v670_v36 }
 0x1c4   :  { %v672_v40 = vmul.f32 %v671_v37, %v641_v30  ;;  %v704_v42 = vmul.f32 %v671_v37, %v671_v37 }
 0x1c6   :  { %v673_v41 = vsel %vm15_vm0, %v672_v40, 0.0  ;;  %v705_v43 = vsel %vm15_vm0, %v704_v42, 0.0 }
 0x1c7   :  { %674 = vadd.xlane.f32.xlu0 %v673_v41 }
 0x1cb   :  { %706 = vadd.xlane.f32.xlu0 %v705_v43 }
 0x248   :  { %v687_v44 = vpop.xlane.xlu1 %686 }
 0x249   :  { %v688_v45 = vrot.slane %v687_v44, 4 }
 0x24b   :  { %v689_v46 = vadd.f32 %v688_v45, %v687_v44 }
 0x24d   :  { %v690_v47 = vrot.slane %v689_v46, 2 }
 0x24f   :  { %v691_v51 = vadd.f32 %v690_v47, %v689_v46 }
 0x250   :  { %v675_v48 = vpop.xlane.xlu0 %674 }
 0x251   :  { %v676_v49 = vrot.slane %v675_v48, 4  ;;  %v692_v55 = vrot.slane %v691_v51, 1 }
 0x253   :  { %v677_v50 = vadd.f32 %v676_v49, %v675_v48  ;;  %v693_v60 = vadd.f32 %v692_v55, %v691_v51 }
 0x254   :  { %v707_v52 = vpop.xlane.xlu0 %706 }
 0x255   :  { %v678_v53 = vrot.slane %v677_v50, 2  ;;  %v708_v38 = vrot.slane %v707_v52, 4 }
 0x257   :  { %v709_v39 = vadd.f32 %v708_v38, %v707_v52  ;;  %v679_v54 = vadd.f32 %v678_v53, %v677_v50 }
 0x259   :  { %v710_v56 = vrot.slane %v709_v39, 2  ;;  %v680_v57 = vrot.slane %v679_v54, 1 }
 0x25b   :  { %v711_v58 = vadd.f32 %v710_v56, %v709_v39  ;;  %v681_v59 = vadd.f32 %v680_v57, %v679_v54 }
 0x25d   :  { %738 = vpush %v681_v59  ;;  %v712_v61 = vrot.slane %v711_v58, 1 }
 0x25e   :  { %740 = vpush %v693_v60 }
 0x25f   :  { %v713_v62 = vadd.f32 %v712_v61, %v711_v58 }
 0x261   :  { %742 = vpush %v713_v62 }
 0x28e   :  { %s739_s13 = spop %738 }
 0x28f   :  { %s741_s14 = spop %740  ;;  %v683_v14 = vstv %s739_s13 }
 0x290   :  { %v695_v63 = vstv %s741_s14  ;;  %v724_v15 = vsub.f32 0.0, %v683_v14 }
 0x291   :  { %745 = vrsqrt.f32 %v695_v63  ;;  %vm698_vm3 = vcmp.eq.f32.partialorder %v695_v63, inf  ;;  %v701_v5 = vand.u32 2147483648, %v695_v63  ;;  %vm700_vm4 = vcmp.eq.f32.partialorder %v695_v63, 0.0 }
 0x292   :  { %s743_s15 = spop %742 }
 0x293   :  { %v715_v0 = vstv %s743_s15 }
 0x294   :  { %747 = vrsqrt.f32 %v715_v0  ;;  %vm718_vm5 = vcmp.eq.f32.partialorder %v715_v0, inf  ;;  %v721_v8 = vand.u32 2147483648, %v715_v0  ;;  %vm720_vm6 = vcmp.eq.f32.partialorder %v715_v0, 0.0 }
 0x29e   :  { %v746_v1 = vpop.eup %745 }
 0x29f   :  { %v697_v2 = vmul.f32 %v746_v1, %v695_v63 }
 0x2a1   :  { %v748_v3 = vpop.eup %747  ;;  %v699_v4 = vsel %vm698_vm3, %v695_v63, %v697_v2 }
 0x2a2   :  { %v717_v6 = vmul.f32 %v748_v3, %v715_v0  ;;  %v702_v7 = vsel %vm700_vm4, %v701_v5, %v699_v4 }
 0x2a3   :  { %v703_v11 = vadd.f32 1e-05, %v702_v7 }
 0x2a4   :  { %v719_v9 = vsel %vm718_vm5, %v715_v0, %v717_v6 }
 0x2a5   :  { %v722_v10 = vsel %vm720_vm6, %v721_v8, %v719_v9 }
 0x2a6   :  { %v723_v12 = vadd.f32 1e-05, %v722_v10 }
 0x2a8   :  { %v725_v13 = vmul.f32 %v723_v12, %v703_v11 }
 0x2aa   :  { %749 = vrcp.f32 %v725_v13 }
 0x2b7   :  { %v750_v16 = vpop.eup %749 }
 0x2b8   :  { %v727_v17 = vmul.f32 %v750_v16, %v724_v15 }
 0x2ba   :  { %v728_v18 = vadd.f32 1.0, %v727_v17 }
 0x2bc   :  { %729 = vst [vmem:[%s847_s2] sm:$0xff] %v728_v18 }

</bundles_post_ra>
